<compile_context>
chip_gen: v5e
topology: v5e:2x2
jax: 0.10.0
libtpu: 0.0.40
codegen_flags: <defaults>
</compile_context>

<pallas_src>
import math
import functools

import jax
import jax.numpy as jnp
from jax import lax
from jax.experimental import pallas as pl
from jax.experimental.pallas import tpu as pltpu


# ----------------------------------------------------------------------------
# small helpers
# ----------------------------------------------------------------------------
def _pick_tile(dim, candidates):
    for c in candidates:
        if dim % c == 0:
            return c
    return dim            # fall back to the full (untiled) dimension


def _pick_row_block(S):
    # largest power-of-two row block that divides S while keeping one (RB, S)
    # f32 temporary under ~4 MiB
    budget = max((4 << 20) // max(S * 4, 1), 8)
    for c in (512, 256, 128, 64, 32, 16, 8):
        if c <= budget and S % c == 0:
            return c
    for c in (512, 256, 128, 64, 32, 16, 8):
        if S % c == 0:
            return c
    return S


def _bytes(dtype):
    return jnp.dtype(dtype).itemsize


def _vmem_limit(needed_bytes):
    # computed per call from actual block/scratch sizes, with headroom for
    # compiler temporaries
    return int(min(max(2 * needed_bytes + (4 << 20), 32 << 20), 112 << 20))


# ----------------------------------------------------------------------------
# fused q/k/v projection + RoPE: q/k/v = x @ W^T (torch (out, in) layout),
# outputs written directly in per-head (B*H, S, D) layout (split-heads folded
# into the output BlockSpecs), RoPE applied to q/k in the f32 epilogue.
# ----------------------------------------------------------------------------
def _qkv_rope_kernel(x_ref, wq_ref, wk_ref, wv_ref, cos_ref, sin_ref, rot_ref,
                     q_ref, k_ref, v_ref, qacc, kacc, vacc):
    @pl.when(pl.program_id(2) == 0)
    def _():
        qacc[...] = jnp.zeros_like(qacc)
        kacc[...] = jnp.zeros_like(kacc)
        vacc[...] = jnp.zeros_like(vacc)

    x = x_ref[...]                                   # (S, tk) bf16, shared by q/k/v
    dims = (((1,), (1,)), ((), ()))                  # contract x dim1 with w dim1
    qacc[...] += lax.dot_general(x, wq_ref[...], dims,
                                 preferred_element_type=jnp.float32)
    kacc[...] += lax.dot_general(x, wk_ref[...], dims,
                                 preferred_element_type=jnp.float32)
    vacc[...] += lax.dot_general(x, wv_ref[...], dims,
                                 preferred_element_type=jnp.float32)

    @pl.when(pl.program_id(2) == pl.num_programs(2) - 1)
    def _():
        cos = cos_ref[...]
        sin = sin_ref[...]
        rot = rot_ref[...]                           # (D, D) rotate_half permutation
        q = qacc[...]
        k = kacc[...]
        q = q * cos + jnp.dot(q, rot, preferred_element_type=jnp.float32) * sin
        k = k * cos + jnp.dot(k, rot, preferred_element_type=jnp.float32) * sin
        q_ref[0] = q.astype(q_ref.dtype)
        k_ref[0] = k.astype(k_ref.dtype)
        v_ref[0] = vacc[...].astype(v_ref.dtype)


def qkv_proj_rope_split_heads(x2, wq, wk, wv, cos, sin, rot, B, S, H, D):
    Hd = wq.shape[1]
    xb = _bytes(x2.dtype)
    # keep the whole reduction in one step when the activation slab is small
    # (the x block index then stays constant across heads -> no re-DMA);
    # otherwise tile K with wide tiles for HBM roofline.
    tk = Hd if S * Hd * xb <= (2 << 20) else _pick_tile(Hd, (512, 256, 128))
    nk = Hd // tk

    needed = (2 * S * tk * xb + 6 * D * tk * xb + 4 * S * D * 4
              + 2 * D * D * 4 + 3 * S * D * 4 + 6 * S * D * xb)
    # TODO(synk): when D is a lane multiple, process >=2 heads of weight per grid
    # step so the MXU N dim is >=256 on v6e/v7x.
    return pl.pallas_call(
        _qkv_rope_kernel,
        out_shape=tuple(jax.ShapeDtypeStruct((B * H, S, D), x2.dtype)
                        for _ in range(3)),
        grid_spec=pltpu.PrefetchScalarGridSpec(
            num_scalar_prefetch=0,
            grid=(B, H, nk),
            in_specs=[
                pl.BlockSpec((S, tk), lambda b, h, k: (b, k)),    # activations
                pl.BlockSpec((D, tk), lambda b, h, k: (h, k)),    # wq (out, in)
                pl.BlockSpec((D, tk), lambda b, h, k: (h, k)),    # wk
                pl.BlockSpec((D, tk), lambda b, h, k: (h, k)),    # wv
                pl.BlockSpec((S, D), lambda b, h, k: (0, 0)),     # cos
                pl.BlockSpec((S, D), lambda b, h, k: (0, 0)),     # sin
                pl.BlockSpec((D, D), lambda b, h, k: (0, 0)),     # rotate_half mat
            ],
            out_specs=[pl.BlockSpec((1, S, D), lambda b, h, k: (b * H + h, 0, 0))
                       for _ in range(3)],
            scratch_shapes=[pltpu.VMEM((S, D), jnp.float32) for _ in range(3)],
        ),
        compiler_params=pltpu.CompilerParams(
            dimension_semantics=("parallel", "parallel", "arbitrary"),
            vmem_limit_bytes=_vmem_limit(needed)),
    )(x2, wq, wk, wv, cos, sin, rot)


# ----------------------------------------------------------------------------
# generic tiled matmul (nn.Linear, bias=False): y = x @ W^T, W torch layout
# ----------------------------------------------------------------------------
def _matmul_kernel(x_ref, w_ref, o_ref, acc_ref):
    @pl.when(pl.program_id(2) == 0)
    def _():
        acc_ref[...] = jnp.zeros_like(acc_ref)

    acc_ref[...] += lax.dot_general(
        x_ref[...], w_ref[...], (((1,), (1,)), ((), ())),
        preferred_element_type=jnp.float32)

    @pl.when(pl.program_id(2) == pl.num_programs(2) - 1)
    def _():
        o_ref[...] = acc_ref[...].astype(o_ref.dtype)


def linear_nobias(x, w, out_dtype=None):
    M, K = x.shape
    N = w.shape[0]
    out_dtype = out_dtype or x.dtype
    tm = _pick_tile(M, (1024, 512, 256, 128, 64, 32, 16, 8))
    tn = _pick_tile(N, (1024, 512, 256, 128))
    tk = _pick_tile(K, (1024, 512, 256, 128))
    xb = _bytes(x.dtype)
    needed = (2 * (tm * tk + tn * tk) * xb + tm * tn * 4
              + 2 * tm * tn * _bytes(out_dtype))
    return pl.pallas_call(
        _matmul_kernel,
        out_shape=jax.ShapeDtypeStruct((M, N), out_dtype),
        grid_spec=pltpu.PrefetchScalarGridSpec(
            num_scalar_prefetch=0,
            grid=(M // tm, N // tn, K // tk),
            in_specs=[
                pl.BlockSpec((tm, tk), lambda i, j, k: (i, k)),
                pl.BlockSpec((tn, tk), lambda i, j, k: (j, k)),
            ],
            out_specs=pl.BlockSpec((tm, tn), lambda i, j, k: (i, j)),
            scratch_shapes=[pltpu.VMEM((tm, tn), jnp.float32)],
        ),
        compiler_params=pltpu.CompilerParams(
            dimension_semantics=("parallel", "parallel", "arbitrary"),
            vmem_limit_bytes=_vmem_limit(needed)),
    )(x, w)


# ----------------------------------------------------------------------------
# attention kernel: one (batch, head) pair per grid step
# ----------------------------------------------------------------------------
def _attn_kernel(minval_ref, q_ref, k_ref, v_ref, mask_ref, o_ref, *scratch,
                 row_block, streaming_budget, selecting_budget, recent_budget,
                 forgetting_factor, masking_mode):
    S = q_ref.shape[1]
    D = q_ref.shape[2]
    RB = row_block
    n_rb = S // RB
    FMIN = float(jnp.finfo(jnp.float32).min)
    INF = jnp.float32(jnp.inf)
    scale = 1.0 / math.sqrt(D)

    def logits_block(r0):
        # one (RB, S) block of q k^T / sqrt(D) + mask, clamped to finfo.min
        qb = q_ref[0, pl.ds(r0, RB), :]
        wb = lax.dot_general(qb, k_ref[0], (((1,), (1,)), ((), ())),
                             preferred_element_type=jnp.float32)
        return jnp.maximum(wb * scale + mask_ref[0, pl.ds(r0, RB), :], FMIN)

    def softmax_pv_block(r0, wb):
        # final f32 softmax of one row block followed by P @ V on the MXU
        mx = jnp.max(wb, axis=-1, keepdims=True)
        ex = jnp.exp(wb - mx)
        p = ex * pl.reciprocal(jnp.sum(ex, axis=-1, keepdims=True), approx=True)
        ob = jnp.dot(p.astype(v_ref.dtype), v_ref[0],
                     preferred_element_type=jnp.float32)
        o_ref[0, pl.ds(r0, RB), :] = ob.astype(o_ref.dtype)

    if masking_mode == 'full':
        def body(rb, carry):
            r0 = pl.multiple_of(rb * RB, RB)
            softmax_pv_block(r0, logits_block(r0))
            return carry
        lax.fori_loop(0, n_rb, body, 0)
        return

    # ------------------------- heavy-hitter (A2S) path -------------------------
    w_scr = scratch[0]                        # single (S, S) f32 logits scratch
    minval = minval_ref[0, 0]
    cb = streaming_budget + selecting_budget + recent_budget
    col = lax.broadcasted_iota(jnp.int32, (1, S), 1)

    # phase 1: logits into the scratch, one query-row block at a time
    def fill_body(rb, carry):
        r0 = pl.multiple_of(rb * RB, RB)
        w_scr[pl.ds(r0, RB), :] = logits_block(r0)
        return carry
    lax.fori_loop(0, n_rb, fill_body, 0)

    if cb < S - 1:
        # ---- warm-up: sel = sum_t ff^(cb-1-t) * softmax(logits[t]) (vectorized) ----
        if cb > 0:
            n_warm = min(-(-cb // RB), n_rb)
            log_ff = math.log(forgetting_factor) if forgetting_factor > 0.0 else 0.0

            def warm_body(rb, sel):
                r0 = pl.multiple_of(rb * RB, RB)
                rows = w_scr[pl.ds(r0, RB), :]
                mw = jnp.max(rows, axis=-1, keepdims=True)
                ew = jnp.exp(rows - mw)
                pw = ew / jnp.sum(ew, axis=-1, keepdims=True)
                ridx = r0 + lax.broadcasted_iota(jnp.int32, (1, RB), 1)
                if forgetting_factor > 0.0:
                    wrow = jnp.where(
                        ridx < cb,
                        jnp.exp(((cb - 1) - ridx).astype(jnp.float32) * log_ff),
                        jnp.float32(0.0))
                else:
                    wrow = (ridx == (cb - 1)).astype(jnp.float32)
                return sel + lax.dot_general(wrow, pw, (((1,), (0,)), ((), ())),
                                             preferred_element_type=jnp.float32)

            sel0 = lax.fori_loop(0, n_warm, warm_body,
                                 jnp.zeros((1, S), jnp.float32))
        else:
            sel0 = jnp.zeros((1, S), jnp.float32)

        # ---- eviction loop: serial over tokens, sel & mask row carried in vregs ----
        # TODO(synk): fold the two cross-lane min reductions (value + first index)
        # into one packed-key reduction to further shorten the serial chain.
        ge_sb = col >= streaming_budget                  # loop-invariant

        def evict_body(t, carry):
            sel, mrow = carry                            # both (1, S) f32
            row = w_scr[pl.ds(t, 1), :]                  # (1, S)
            mx = jnp.max(row, axis=-1, keepdims=True)
            e = jnp.exp(row - mx) * mrow                 # masked, un-normalized
            # exact division (not approx reciprocal) so near-tie evictions match
            # the PyTorch reference
            cur = e / jnp.sum(e, axis=-1, keepdims=True)

            if forgetting_factor != 0.0:
                sel = forgetting_factor * sel + cur
            else:
                sel = jnp.where(sel == INF, sel, jnp.float32(0.0)) + cur

            # argmin over sel[streaming_budget : t - recent_budget + 1]
            valid = ge_sb & (col <= t - recent_budget)
            masked = jnp.where(valid, sel, INF)
            mval = jnp.min(masked, axis=-1, keepdims=True)
            min_idx = jnp.min(jnp.where(masked == mval, col, S),
                              axis=-1, keepdims=True)
            is_min = col == min_idx

            sel = jnp.where(is_min, INF, sel)
            mrow = jnp.where(is_min, jnp.float32(0.0), mrow)

            # finalize logits row t+1 with the cumulative heavy-hitter mask
            nxt = w_scr[pl.ds(t + 1, 1), :]
            w_scr[pl.ds(t + 1, 1), :] = jnp.where(mrow > 0.5, nxt, minval)
            return sel, mrow

        mrow0 = jnp.ones((1, S), jnp.float32)
        lax.fori_loop(cb, S - 1, evict_body, (sel0, mrow0), unroll=4)

    # phase 3: final softmax + P @ V, per row block, reading the scratch
    def out_body(rb, carry):
        r0 = pl.multiple_of(rb * RB, RB)
        softmax_pv_block(r0, w_scr[pl.ds(r0, RB), :])
        return carry
    lax.fori_loop(0, n_rb, out_body, 0)


# ----------------------------------------------------------------------------
# full module forward
# ----------------------------------------------------------------------------
def llama_attention_heavy_hitter(hidden_states, attention_mask, params, config,
                                 compute_dtype=jnp.bfloat16):
    B, S, Hd = hidden_states.shape
    H = config['num_attention_heads']
    D = Hd // H
    half = D // 2

    streaming_budget = math.floor(config['streaming_ratio'] * S + 0.5)
    selecting_budget = math.floor(config['selecting_ratio'] * S + 0.5)
    recent_budget = math.floor(config['recent_ratio'] * S + 0.5)
    heavy = config['masking_mode'] != 'full'

    # bf16 MXU operands, f32 accumulation; softmax/mask math stays f32
    cdt = compute_dtype
    x2 = hidden_states.reshape(B * S, Hd).astype(cdt)
    wq = params['wq'].astype(cdt)
    wk = params['wk'].astype(cdt)
    wv = params['wv'].astype(cdt)
    wo = params['wo'].astype(cdt)

    # LlamaRotaryEmbedding tables (position_ids = arange(S)) and the
    # rotate_half signed-permutation matrix — host constants in f32
    inv_freq = 1.0 / (10000.0 ** (jnp.arange(0, D, 2, dtype=jnp.float32) / D))
    t = jnp.arange(S, dtype=jnp.float32)
    freqs = jnp.outer(t, inv_freq)
    emb = jnp.concatenate([freqs, freqs], axis=-1)
    cos, sin = jnp.cos(emb), jnp.sin(emb)
    ri = jnp.arange(D)[:, None]
    ci = jnp.arange(D)[None, :]
    rot = (jnp.where(ri == ci + half, -1.0, 0.0)
           + jnp.where(ri + half == ci, 1.0, 0.0)).astype(jnp.float32)

    # fused q/k/v projection + RoPE, written directly in per-head layout
    qh, kh, vh = qkv_proj_rope_split_heads(x2, wq, wk, wv, cos, sin, rot,
                                           B, S, H, D)

    mask3 = attention_mask.reshape(B, S, S).astype(jnp.float32)
    # reference: attn_weights[~mask_bottom] = torch.min(attention_mask)
    minval = jnp.min(attention_mask).reshape(1, 1).astype(jnp.float32)

    RB = _pick_row_block(S)
    kernel = functools.partial(
        _attn_kernel,
        row_block=RB,
        streaming_budget=streaming_budget,
        selecting_budget=selecting_budget,
        recent_budget=recent_budget,
        forgetting_factor=config['forgetting_factor'],
        masking_mode=config['masking_mode'],
    )

    # fold merge-heads into the output BlockSpec when head_dim is a lane multiple
    fold_merge = (D % 128 == 0)
    if fold_merge:
        out_shape = jax.ShapeDtypeStruct((B, S, Hd), cdt)
        out_spec = pl.BlockSpec((1, S, D), lambda i: (i // H, 0, i % H))
    else:
        out_shape = jax.ShapeDtypeStruct((B * H, S, D), cdt)
        out_spec = pl.BlockSpec((1, S, D), lambda i: (i, 0, 0))

    xb = _bytes(cdt)
    attn_needed = (6 * S * D * xb + 2 * S * S * 4 + 2 * S * D * xb
                   + (S * S * 4 if heavy else 0) + 4 * RB * S * 4 + 4 * S * 4)

    attn = pl.pallas_call(
        kernel,
        out_shape=out_shape,
        grid_spec=pltpu.PrefetchScalarGridSpec(
            num_scalar_prefetch=0,
            grid=(B * H,),
            in_specs=[
                pl.BlockSpec(memory_space=pltpu.MemorySpace.SMEM),   # minval
                pl.BlockSpec((1, S, D), lambda i: (i, 0, 0)),        # q (RoPE'd)
                pl.BlockSpec((1, S, D), lambda i: (i, 0, 0)),        # k (RoPE'd)
                pl.BlockSpec((1, S, D), lambda i: (i, 0, 0)),        # v
                pl.BlockSpec((1, S, S), lambda i: (i // H, 0, 0)),   # additive mask
            ],
            out_specs=out_spec,
            scratch_shapes=([pltpu.VMEM((S, S), jnp.float32)] if heavy else []),
        ),
        compiler_params=pltpu.CompilerParams(
            dimension_semantics=("parallel",),
            vmem_limit_bytes=_vmem_limit(attn_needed)),
    )(minval, qh, kh, vh, mask3)

    if fold_merge:
        x_o = attn.reshape(B * S, Hd)
    else:
        # TODO(synk): for head_dim % 128 != 0 one XLA transpose remains; the
        # fold_merge branch above removes it for lane-multiple head dims.
        x_o = attn.reshape(B, H, S, D).transpose(0, 2, 1, 3).reshape(B * S, Hd)

    out = linear_nobias(x_o, wo, out_dtype=hidden_states.dtype).reshape(B, S, Hd)

    # matches (attn_output, attn_weights=None, past_key_value=None)
    return out, None, None


if __name__ == "__main__":
    B, S, H, D = 2, 16, 4, 8
    hidden = H * D

    config = dict(
        hidden_size=hidden,
        num_attention_heads=H,
        max_position_embeddings=64,
        streaming_ratio=0.25,
        selecting_ratio=0.25,
        recent_ratio=0.25,
        forgetting_factor=0.9,
        masking_mode='a2s',   # anything != 'full' enables heavy-hitter masking
    )

    key = jax.random.PRNGKey(0)
    k1, k2, k3, k4, k5 = jax.random.split(key, 5)
    params = {
        'wq': jax.random.normal(k1, (hidden, hidden), jnp.float32) * 0.05,
        'wk': jax.random.normal(k2, (hidden, hidden), jnp.float32) * 0.05,
        'wv': jax.random.normal(k3, (hidden, hidden), jnp.float32) * 0.05,
        'wo': jax.random.normal(k4, (hidden, hidden), jnp.float32) * 0.05,
    }
    x = jax.random.normal(k5, (B, S, hidden), jnp.float32)

    # standard HF additive causal mask (B, 1, S, S): 0 allowed, finfo.min masked
    neg = jnp.finfo(jnp.float32).min
    causal = jnp.where(
        jnp.arange(S)[:, None] >= jnp.arange(S)[None, :], 0.0, neg
    ).astype(jnp.float32)
    attention_mask = jnp.broadcast_to(causal, (B, 1, S, S))

    out, _, _ = llama_attention_heavy_hitter(x, attention_mask, params, config)
    jax.block_until_ready(out)
    print("KERNEL_OK")
</pallas_src>

<mosaic_0001>
module attributes {stable_mosaic.version = 11 : i64} {
  func.func @_qkv_rope_kernel(%arg0: i32, %arg1: i32, %arg2: i32, %arg3: memref<16x32xbf16, #tpu.memory_space<vmem>>, %arg4: memref<8x32xbf16, #tpu.memory_space<vmem>>, %arg5: memref<8x32xbf16, #tpu.memory_space<vmem>>, %arg6: memref<8x32xbf16, #tpu.memory_space<vmem>>, %arg7: memref<16x8xf32, #tpu.memory_space<vmem>>, %arg8: memref<16x8xf32, #tpu.memory_space<vmem>>, %arg9: memref<8x8xf32, #tpu.memory_space<vmem>>, %arg10: memref<1x16x8xbf16, #tpu.memory_space<vmem>>, %arg11: memref<1x16x8xbf16, #tpu.memory_space<vmem>>, %arg12: memref<1x16x8xbf16, #tpu.memory_space<vmem>>, %arg13: memref<16x8xf32, #tpu.memory_space<vmem>>, %arg14: memref<16x8xf32, #tpu.memory_space<vmem>>, %arg15: memref<16x8xf32, #tpu.memory_space<vmem>>) attributes {dimension_semantics = [#tpu.dimension_semantics<parallel>, #tpu.dimension_semantics<parallel>, #tpu.dimension_semantics<arbitrary>], iteration_bounds = array<i64: 2, 4, 1>, scalar_prefetch = 0 : i64, scratch_operands = 3 : i64, tpu.core_type = #tpu.core_type<tc>, window_params = [{transform_indices = @transform_0, window_bounds = array<i64: 16, 32>}, {transform_indices = @transform_1, window_bounds = array<i64: 8, 32>}, {transform_indices = @transform_2, window_bounds = array<i64: 8, 32>}, {transform_indices = @transform_3, window_bounds = array<i64: 8, 32>}, {pipeline_mode = #tpu.pipeline_mode<synchronous>, transform_indices = @transform_4, window_bounds = array<i64: 16, 8>}, {pipeline_mode = #tpu.pipeline_mode<synchronous>, transform_indices = @transform_5, window_bounds = array<i64: 16, 8>}, {pipeline_mode = #tpu.pipeline_mode<synchronous>, transform_indices = @transform_6, window_bounds = array<i64: 8, 8>}, {transform_indices = @transform_7, window_bounds = array<i64: 1, 16, 8>}, {transform_indices = @transform_8, window_bounds = array<i64: 1, 16, 8>}, {transform_indices = @transform_9, window_bounds = array<i64: 1, 16, 8>}]} {
    %c0_i32 = arith.constant 0 : i32
    %0 = arith.cmpi eq, %arg2, %c0_i32 : i32
    %1 = arith.extui %0 : i1 to i32
    %c0_i32_0 = arith.constant 0 : i32
    %2 = arith.cmpi ne, %1, %c0_i32_0 : i32
    scf.if %2 {
      %cst_24 = arith.constant 0.000000e+00 : f32
      %22 = vector.broadcast %cst_24 : f32 to vector<16x8xf32>
      %c0_25 = arith.constant 0 : index
      %c0_26 = arith.constant 0 : index
      %23 = vector.load %arg13[%c0_25, %c0_26] : memref<16x8xf32, #tpu.memory_space<vmem>>, vector<16x8xf32>
      tpu.vector_store %arg13[%c0_25, %c0_26], %22 {strides = array<i32>} : memref<16x8xf32, #tpu.memory_space<vmem>>, vector<16x8xf32>,
      %cst_27 = arith.constant 0.000000e+00 : f32
      %24 = vector.broadcast %cst_27 : f32 to vector<16x8xf32>
      %c0_28 = arith.constant 0 : index
      %c0_29 = arith.constant 0 : index
      %25 = vector.load %arg14[%c0_28, %c0_29] : memref<16x8xf32, #tpu.memory_space<vmem>>, vector<16x8xf32>
      tpu.vector_store %arg14[%c0_28, %c0_29], %24 {strides = array<i32>} : memref<16x8xf32, #tpu.memory_space<vmem>>, vector<16x8xf32>,
      %cst_30 = arith.constant 0.000000e+00 : f32
      %26 = vector.broadcast %cst_30 : f32 to vector<16x8xf32>
      %c0_31 = arith.constant 0 : index
      %c0_32 = arith.constant 0 : index
      %27 = vector.load %arg15[%c0_31, %c0_32] : memref<16x8xf32, #tpu.memory_space<vmem>>, vector<16x8xf32>
      tpu.vector_store %arg15[%c0_31, %c0_32], %26 {strides = array<i32>} : memref<16x8xf32, #tpu.memory_space<vmem>>, vector<16x8xf32>,
    } else {
    }
    %c0 = arith.constant 0 : index
    %c0_1 = arith.constant 0 : index
    %3 = vector.load %arg3[%c0, %c0_1] : memref<16x32xbf16, #tpu.memory_space<vmem>>, vector<16x32xbf16>
    %c0_2 = arith.constant 0 : index
    %c0_3 = arith.constant 0 : index
    %4 = vector.load %arg13[%c0_2, %c0_3] : memref<16x8xf32, #tpu.memory_space<vmem>>, vector<16x8xf32>
    %c0_4 = arith.constant 0 : index
    %c0_5 = arith.constant 0 : index
    %5 = vector.load %arg4[%c0_4, %c0_5] : memref<8x32xbf16, #tpu.memory_space<vmem>>, vector<8x32xbf16>
    %cst = arith.constant dense<0.000000e+00> : vector<16x8xf32>
    %6 = tpu.matmul %3, %5, %cst {dimension_numbers = #tpu.dot_dimension_numbers<[1], [1], [0], [0], [0, 0, 1, 0], [], []>} : vector<16x32xbf16>, vector<8x32xbf16>, vector<16x8xf32> -> vector<16x8xf32>
    %7 = arith.addf %4, %6 : vector<16x8xf32>
    %c0_6 = arith.constant 0 : index
    %c0_7 = arith.constant 0 : index
    %8 = vector.load %arg13[%c0_6, %c0_7] : memref<16x8xf32, #tpu.memory_space<vmem>>, vector<16x8xf32>
    tpu.vector_store %arg13[%c0_6, %c0_7], %7 {strides = array<i32>} : memref<16x8xf32, #tpu.memory_space<vmem>>, vector<16x8xf32>,
    %c0_8 = arith.constant 0 : index
    %c0_9 = arith.constant 0 : index
    %9 = vector.load %arg14[%c0_8, %c0_9] : memref<16x8xf32, #tpu.memory_space<vmem>>, vector<16x8xf32>
    %c0_10 = arith.constant 0 : index
    %c0_11 = arith.constant 0 : index
    %10 = vector.load %arg5[%c0_10, %c0_11] : memref<8x32xbf16, #tpu.memory_space<vmem>>, vector<8x32xbf16>
    %cst_12 = arith.constant dense<0.000000e+00> : vector<16x8xf32>
    %11 = tpu.matmul %3, %10, %cst_12 {dimension_numbers = #tpu.dot_dimension_numbers<[1], [1], [0], [0], [0, 0, 1, 0], [], []>} : vector<16x32xbf16>, vector<8x32xbf16>, vector<16x8xf32> -> vector<16x8xf32>
    %12 = arith.addf %9, %11 : vector<16x8xf32>
    %c0_13 = arith.constant 0 : index
    %c0_14 = arith.constant 0 : index
    %13 = vector.load %arg14[%c0_13, %c0_14] : memref<16x8xf32, #tpu.memory_space<vmem>>, vector<16x8xf32>
    tpu.vector_store %arg14[%c0_13, %c0_14], %12 {strides = array<i32>} : memref<16x8xf32, #tpu.memory_space<vmem>>, vector<16x8xf32>,
    %c0_15 = arith.constant 0 : index
    %c0_16 = arith.constant 0 : index
    %14 = vector.load %arg15[%c0_15, %c0_16] : memref<16x8xf32, #tpu.memory_space<vmem>>, vector<16x8xf32>
    %c0_17 = arith.constant 0 : index
    %c0_18 = arith.constant 0 : index
    %15 = vector.load %arg6[%c0_17, %c0_18] : memref<8x32xbf16, #tpu.memory_space<vmem>>, vector<8x32xbf16>
    %cst_19 = arith.constant dense<0.000000e+00> : vector<16x8xf32>
    %16 = tpu.matmul %3, %15, %cst_19 {dimension_numbers = #tpu.dot_dimension_numbers<[1], [1], [0], [0], [0, 0, 1, 0], [], []>} : vector<16x32xbf16>, vector<8x32xbf16>, vector<16x8xf32> -> vector<16x8xf32>
    %17 = arith.addf %14, %16 : vector<16x8xf32>
    %c0_20 = arith.constant 0 : index
    %c0_21 = arith.constant 0 : index
    %18 = vector.load %arg15[%c0_20, %c0_21] : memref<16x8xf32, #tpu.memory_space<vmem>>, vector<16x8xf32>
    tpu.vector_store %arg15[%c0_20, %c0_21], %17 {strides = array<i32>} : memref<16x8xf32, #tpu.memory_space<vmem>>, vector<16x8xf32>,
    %c0_i32_22 = arith.constant 0 : i32
    %19 = arith.cmpi eq, %arg2, %c0_i32_22 : i32
    %20 = arith.extui %19 : i1 to i32
    %c0_i32_23 = arith.constant 0 : i32
    %21 = arith.cmpi ne, %20, %c0_i32_23 : i32
    scf.if %21 {
      %c0_24 = arith.constant 0 : index
      %c0_25 = arith.constant 0 : index
      %22 = vector.load %arg7[%c0_24, %c0_25] : memref<16x8xf32, #tpu.memory_space<vmem>>, vector<16x8xf32>
      %c0_26 = arith.constant 0 : index
      %c0_27 = arith.constant 0 : index
      %23 = vector.load %arg8[%c0_26, %c0_27] : memref<16x8xf32, #tpu.memory_space<vmem>>, vector<16x8xf32>
      %c0_28 = arith.constant 0 : index
      %c0_29 = arith.constant 0 : index
      %24 = vector.load %arg9[%c0_28, %c0_29] : memref<8x8xf32, #tpu.memory_space<vmem>>, vector<8x8xf32>
      %c0_30 = arith.constant 0 : index
      %c0_31 = arith.constant 0 : index
      %25 = vector.load %arg13[%c0_30, %c0_31] : memref<16x8xf32, #tpu.memory_space<vmem>>, vector<16x8xf32>
      %c0_32 = arith.constant 0 : index
      %c0_33 = arith.constant 0 : index
      %26 = vector.load %arg14[%c0_32, %c0_33] : memref<16x8xf32, #tpu.memory_space<vmem>>, vector<16x8xf32>
      %27 = arith.mulf %25, %22 : vector<16x8xf32>
      %cst_34 = arith.constant dense<0.000000e+00> : vector<16x8xf32>
      %28 = tpu.matmul %25, %24, %cst_34 {dimension_numbers = #tpu.dot_dimension_numbers<[1], [0], [0], [1], [0, 0, 1, 1], [], []>} : vector<16x8xf32>, vector<8x8xf32>, vector<16x8xf32> -> vector<16x8xf32>
      %29 = arith.mulf %28, %23 : vector<16x8xf32>
      %30 = arith.addf %27, %29 : vector<16x8xf32>
      %31 = arith.mulf %26, %22 : vector<16x8xf32>
      %cst_35 = arith.constant dense<0.000000e+00> : vector<16x8xf32>
      %32 = tpu.matmul %26, %24, %cst_35 {dimension_numbers = #tpu.dot_dimension_numbers<[1], [0], [0], [1], [0, 0, 1, 1], [], []>} : vector<16x8xf32>, vector<8x8xf32>, vector<16x8xf32> -> vector<16x8xf32>
      %33 = arith.mulf %32, %23 : vector<16x8xf32>
      %34 = arith.addf %31, %33 : vector<16x8xf32>
      %35 = arith.truncf %30 : vector<16x8xf32> to vector<16x8xbf16>
      %c0_36 = arith.constant 0 : index
      %c0_37 = arith.constant 0 : index
      %c0_38 = arith.constant 0 : index
      %36 = vector.load %arg10[%c0_36, %c0_37, %c0_38] : memref<1x16x8xbf16, #tpu.memory_space<vmem>>, vector<1x16x8xbf16>
      %37 = vector.shape_cast %36 : vector<1x16x8xbf16> to vector<16x8xbf16>
      %38 = vector.shape_cast %35 : vector<16x8xbf16> to vector<1x16x8xbf16>
      tpu.vector_store %arg10[%c0_36, %c0_37, %c0_38], %38 {strides = array<i32>} : memref<1x16x8xbf16, #tpu.memory_space<vmem>>, vector<1x16x8xbf16>,
      %39 = arith.truncf %34 : vector<16x8xf32> to vector<16x8xbf16>
      %c0_39 = arith.constant 0 : index
      %c0_40 = arith.constant 0 : index
      %c0_41 = arith.constant 0 : index
      %40 = vector.load %arg11[%c0_39, %c0_40, %c0_41] : memref<1x16x8xbf16, #tpu.memory_space<vmem>>, vector<1x16x8xbf16>
      %41 = vector.shape_cast %40 : vector<1x16x8xbf16> to vector<16x8xbf16>
      %42 = vector.shape_cast %39 : vector<16x8xbf16> to vector<1x16x8xbf16>
      tpu.vector_store %arg11[%c0_39, %c0_40, %c0_41], %42 {strides = array<i32>} : memref<1x16x8xbf16, #tpu.memory_space<vmem>>, vector<1x16x8xbf16>,
      %c0_42 = arith.constant 0 : index
      %c0_43 = arith.constant 0 : index
      %43 = vector.load %arg15[%c0_42, %c0_43] : memref<16x8xf32, #tpu.memory_space<vmem>>, vector<16x8xf32>
      %44 = arith.truncf %43 : vector<16x8xf32> to vector<16x8xbf16>
      %c0_44 = arith.constant 0 : index
      %c0_45 = arith.constant 0 : index
      %c0_46 = arith.constant 0 : index
      %45 = vector.load %arg12[%c0_44, %c0_45, %c0_46] : memref<1x16x8xbf16, #tpu.memory_space<vmem>>, vector<1x16x8xbf16>
      %46 = vector.shape_cast %45 : vector<1x16x8xbf16> to vector<16x8xbf16>
      %47 = vector.shape_cast %44 : vector<16x8xbf16> to vector<1x16x8xbf16>
      tpu.vector_store %arg12[%c0_44, %c0_45, %c0_46], %47 {strides = array<i32>} : memref<1x16x8xbf16, #tpu.memory_space<vmem>>, vector<1x16x8xbf16>,
    } else {
    }
    return
  }
  func.func @transform_0(%arg0: i32, %arg1: i32, %arg2: i32) -> (i32, i32) {
    %c0_i32 = arith.constant 0 : i32
    return %arg0, %arg2 : i32, i32
  }
  func.func @transform_1(%arg0: i32, %arg1: i32, %arg2: i32) -> (i32, i32) {
    %c0_i32 = arith.constant 0 : i32
    return %arg1, %arg2 : i32, i32
  }
  func.func @transform_2(%arg0: i32, %arg1: i32, %arg2: i32) -> (i32, i32) {
    %c0_i32 = arith.constant 0 : i32
    return %arg1, %arg2 : i32, i32
  }
  func.func @transform_3(%arg0: i32, %arg1: i32, %arg2: i32) -> (i32, i32) {
    %c0_i32 = arith.constant 0 : i32
    return %arg1, %arg2 : i32, i32
  }
  func.func @transform_4(%arg0: i32, %arg1: i32, %arg2: i32) -> (i32, i32) {
    %c0_i32 = arith.constant 0 : i32
    %c0_i32_0 = arith.constant 0 : i32
    %c0_i32_1 = arith.constant 0 : i32
    return %c0_i32, %c0_i32_0 : i32, i32
  }
  func.func @transform_5(%arg0: i32, %arg1: i32, %arg2: i32) -> (i32, i32) {
    %c0_i32 = arith.constant 0 : i32
    %c0_i32_0 = arith.constant 0 : i32
    %c0_i32_1 = arith.constant 0 : i32
    return %c0_i32, %c0_i32_0 : i32, i32
  }
  func.func @transform_6(%arg0: i32, %arg1: i32, %arg2: i32) -> (i32, i32) {
    %c0_i32 = arith.constant 0 : i32
    %c0_i32_0 = arith.constant 0 : i32
    %c0_i32_1 = arith.constant 0 : i32
    return %c0_i32, %c0_i32_0 : i32, i32
  }
  func.func @transform_7(%arg0: i32, %arg1: i32, %arg2: i32) -> (i32, i32, i32) {
    %c4_i32 = arith.constant 4 : i32
    %0 = arith.muli %arg0, %c4_i32 : i32
    %1 = arith.addi %0, %arg1 : i32
    %c0_i32 = arith.constant 0 : i32
    %c0_i32_0 = arith.constant 0 : i32
    %c0_i32_1 = arith.constant 0 : i32
    return %1, %c0_i32, %c0_i32_0 : i32, i32, i32
  }
  func.func @transform_8(%arg0: i32, %arg1: i32, %arg2: i32) -> (i32, i32, i32) {
    %c4_i32 = arith.constant 4 : i32
    %0 = arith.muli %arg0, %c4_i32 : i32
    %1 = arith.addi %0, %arg1 : i32
    %c0_i32 = arith.constant 0 : i32
    %c0_i32_0 = arith.constant 0 : i32
    %c0_i32_1 = arith.constant 0 : i32
    return %1, %c0_i32, %c0_i32_0 : i32, i32, i32
  }
  func.func @transform_9(%arg0: i32, %arg1: i32, %arg2: i32) -> (i32, i32, i32) {
    %c4_i32 = arith.constant 4 : i32
    %0 = arith.muli %arg0, %c4_i32 : i32
    %1 = arith.addi %0, %arg1 : i32
    %c0_i32 = arith.constant 0 : i32
    %c0_i32_0 = arith.constant 0 : i32
    %c0_i32_1 = arith.constant 0 : i32
    return %1, %c0_i32, %c0_i32_0 : i32, i32, i32
  }
}

</mosaic_0001>

<bundles_post_ra>
// kernel: tpu_custom_call.1
= control target key start
LH: loop header
LB: loop body
LE: loop exit
PB: predicated region body
PF: predicated region fallthrough
CT: control target
= control target key end

     0   :  { %s1430_s0 = inlined_call_operand.vmem [shape: bf16[32,32], index: 0, kind: input, shape index: {}]   ;;  %s1431_s1 = inlined_call_operand.vmem [shape: bf16[32,32], index: 1, kind: input, shape index: {}]   ;;  %s1432_s2 = inlined_call_operand.hbm [shape: bf16[32,32], index: 2, kind: input, shape index: {}]   ;;  %s1433_s3 = inlined_call_operand.hbm [shape: bf16[32,32], index: 3, kind: input, shape index: {}]   ;;  %s1434_s4 = inlined_call_operand.vmem [shape: f32[16,8], index: 4, kind: input, shape index: {}]   ;;  %s1435_s5 = inlined_call_operand.vmem [shape: f32[16,8], index: 5, kind: input, shape index: {}]   ;;  %s1436_s6 = inlined_call_operand.vmem [shape: f32[8,8], index: 6, kind: input, shape index: {}]   ;;  %s1437_s7 = inlined_call_operand.vmem [shape: bf16[8,16,8], index: 7, kind: output, shape index: {0}]   ;;  %s1438_s8 = inlined_call_operand.vmem [shape: bf16[8,16,8], index: 8, kind: output, shape index: {1}]   ;;  %s1439_s9 = inlined_call_operand.vmem [shape: bf16[8,16,8], index: 9, kind: output, shape index: {2}]  }
   0x1   :  { %1444 = sst [smem:[#allocation17_spill]] %s1432_s2 }
   0x2   :  { %15 = vsyncpa [#allocation6], 0 }
   0x3   :  { %17 = vsyncpa [#allocation6 + $0x1], 0 }
   0x4   :  { %18 = vsyncpa [#allocation8], 0 }
   0x5   :  { %20 = vsyncpa [#allocation8 + $0x1], 0  ;;  %s1252_s30 = smov 0   ;;  %s1254_s10 = smov 0  }
   0x6   :  { %s1256_s11 = smov 0   ;;  %s1258_s12 = smov 0  }
   0x7   :  { %s1260_s13 = smov 0   ;;  %s1262_s14 = smov 0  }
   0x8   :  { %s1264_s15 = smov 0   ;;  %s1266_s16 = smov 0  }
   0x9 LB: > { %1445 = sst [smem:[#allocation11_spill]] %s1179_s11  ;;  %s945_s17 = sadd.s32 4294967295, %s1199_s16   ;;  %s1199_s16 = sphi %s1266_s16, %s26_s16   ;;  %s1195_s15 = sphi %s1264_s15, %s1459_s15   ;;  %s1191_s14 = sphi %s1262_s14, %s1458_s14   ;;  %s1187_s13 = sphi %s1260_s13, %s1457_s13   ;;  %s1183_s12 = sphi %s1258_s12, %s1456_s12   ;;  %s1179_s11 = sphi %s1256_s11, %s1455_s11   ;;  %s1175_s10 = sphi %s1254_s10, %s1461_s10   ;;  %s1171_s30 = sphi %s1252_s30, %s1460_s30  }
   0xa   : > { %1446 = sst [smem:[#allocation12_spill]] %s1191_s14  ;;  %s41_s18 = sadd.s32 1, %s1191_s14 }
   0xb   : > { %1447 = sst [smem:[#allocation13_spill]] %s1195_s15  ;;  %p43_p0 = scmp.ge.s32.totalorder %s41_s18, 4 }
   0xc   : > { %s45_s19 = sadd.s32 1, %s1195_s15  ;;  %s110_s20 = sadd.s32 1, %s1179_s11 }
   0xd   : > { %p117_p1 = scmp.ne.s32.totalorder %s1179_s11, %s1175_s10  ;;  %s1463_s18 = smov (%p43_p0, %s41_s18), 0 }
   0xe   : > { %1448 = sst [smem:[#allocation14_spill]] %s1463_s18  ;;  %s1465_s19 = smov (!%p43_p0, %s45_s19), %s1195_s15 }
   0xf   : > { %s105_s21 = ssub.s32 %s1191_s14, %s1463_s18  ;;  %p118_p2 = scmp.eq.s32.totalorder %s1199_s16, 0 }
  0x10   : > { %p47_p3 = scmp.ge.s32.totalorder %s1465_s19, 2  ;;  %p108_p4 = scmp.eq.s32.totalorder %s105_s21, 0 }
  0x11   : > { %p1302_p5 = por %p118_p2, %p117_p1  ;;  %p123_p6 = scmp.ne.s32.totalorder %s1175_s10, %s1171_s30 }
  0x12   : > { %s1467_s19 = smov (%p47_p3, %s1465_s19), 0  ;;  %p124_p7 = scmp.eq.s32.totalorder %s945_s17, 0 }
  0x13   : > { %1450 = sst [smem:[#allocation15_spill]] %s1467_s19  ;;  %p1003_p8 = scmp.lt.s32.totalorder %s1199_s16, 8 }
  0x14   : > { %s1310_s23 = scalar_select %p108_p4, %s1179_s11, %s110_s20  }
  0x15   : > { %s359_s24 = sand.u32 1, %s1179_s11   ;;  %p1314_p9 = por %p124_p7, %p123_p6 }
  0x16   : > { %1451 = sst [smem:[#allocation16_spill]] %s1310_s23  ;;  %s955_s26 = sshll.u32 %s359_s24, 2 }
  0x17   : > { %s956_s27 = sshll.u32 %s1191_s14, 2  ;;  %s1453_s2 = sld [smem:[#allocation17_spill]] }
  0x18   : > { %s363_s18 = scalar_lea.vmem [#allocation5], %s955_s26  ;;  %p997_p10 = pnand %p1003_p8, %p1302_p5 }
  0x19   : > { %s372_s15 = sshll.u32 %s363_s18, 4  ;;  %p959_p11 = scmp.ge.s32.totalorder %s1199_s16, 1  ;;  %s373_s15 = int_to_ptr.vmem [resolvable:$true] %s372_s15 }
  0x1a   : > { %p397_p12 = scmp.lt.s32.totalorder %s1199_s16, 9  ;;  %s360_s17 = scalar_lea.sflag [#allocation6], %s359_s24 }
  0x1b   : > { %s388_s14 = scalar_lea.hbm %s1433_s3, %s956_s27  ;;  %s383_s11 = scalar_lea.vmem [#allocation7], %s955_s26 }
  0x1c   : > { %p398_p13 = pnand %p959_p11, %p397_p12  ;;  %s390_s23 = sshll.u32 %s388_s14, 4  ;;  %s391_s23 = int_to_ptr.hbm [resolvable:$true] %s390_s23 }
  0x1d   : > { %s368_s21 = scalar_lea.hbm %s1453_s2, %s956_s27  ;;  %s392_s28 = sshll.u32 %s383_s11, 4  ;;  %s393_s28 = int_to_ptr.vmem [resolvable:$true] %s392_s28 }
  0x1e   : > { %s370_s30 = sshll.u32 %s368_s21, 4  ;;  %s380_s29 = scalar_lea.sflag [#allocation8], %s359_s24  ;;  %s371_s30 = int_to_ptr.hbm [resolvable:$true] %s370_s30 }
  0x1f   : > { %999 = dma.hbm_to_vmem [thread:$0]  (!%p997_p10), %s371_s30, 64, %s373_s15, %s360_s17  }
  0x20   : > { %1002 = dma.hbm_to_vmem [thread:$0]  (!%p997_p10), %s391_s23, 64, %s393_s28, %s380_s29  }
  0x21   : > { %401 = sbr.rel (%p398_p13) target bundleno = 355 (0x163), region = 48  ;;  %s403_s18 = sand.u32 (!%p398_p13), 1, %s1175_s10  }
  0x22   : > { %s960_s22 = sshll.u32 (!%p398_p13), %s403_s18, 2  ;;  %s404_s21 = scalar_lea.sflag (!%p398_p13), [#allocation6], %s403_s18 }
  0x23   : > { %s407_s2 = scalar_lea.vmem (!%p398_p13), [#allocation5], %s960_s22 }
  0x26   : > { %1162 = dma.done.wait (%p1314_p9), %s404_s21, 64  }
  0x27   : > { %1164 = vsyncadd (%p1314_p9), %s404_s21, 4294967232  ;;  %s414_s14 = scalar_lea.sflag [#allocation8], %s403_s18  ;;  %s417_s15 = scalar_lea.vmem [#allocation7], %s960_s22 }
  0x28   : > { %1166 = dma.done.wait (%p1314_p9), %s414_s14, 64  }
  0x29   : > { %1168 = vsyncadd (%p1314_p9), %s414_s14, 4294967232  ;;  %p498_p0 = scmp.lt.s32.totalorder %s1183_s12, 3  ;;  %s962_s11 = sshll.u32 %s1187_s13, 1  ;;  %vm537_vm0 = vcmask 64512   ;;  %v1201_v0 = vmov 0.0   ;;  %vm554_vm1 = vcmask 261120  }
  0x2a   : > { %p490_p1 = scmp.lt.s32.totalorder %s962_s11, 3  ;;  %538 = vst.msk [vmem:[#allocation2] sm:$0xff] %vm537_vm0, %v1201_v0  ;;  %v582_v2 = vld [vmem:[%s407_s2] sm:$0xf]  ;;  %v606_v6 = vld [vmem:[%s417_s15] sm:$0xf] }
  0x2b   : > { %s499_s19 = scalar_select %p498_p0, %s1183_s12, 3  ;;  %539 = vst.msk [vmem:[#allocation2 + $0x8] sm:$0xff] %vm537_vm0, %v1201_v0  ;;  %v584_v4 = vsel %vm554_vm1, %v582_v2, 0  ;;  %v608_v7 = vsel %vm554_vm1, %v606_v6, 0  ;;  %v635_v8 = vld [vmem:[%s1436_s6] sm:$0xff]  ;;  %vm712_vm2 = vcmask 60416  }
  0x2c   : > { %s1469_s11 = smov (!%p490_p1, %s962_s11), 3  ;;  %540 = vst.msk [vmem:[#allocation3] sm:$0xff] %vm537_vm0, %v1201_v0  ;;  %593 = vmatpush.bf16.xpose.msra.mxu1 %v584_v4  ;;  %617 = vmatpush.bf16.xpose.msra.mxu2 %v608_v7  ;;  %s965_s29 = sshll.u32 %s1187_s13, 2  ;;  %v631_v35 = vld [vmem:[%s1434_s4] sm:$0xff]  ;;  %v632_v42 = vld [vmem:[%s1434_s4 + $0x8] sm:$0xff] }
  0x2d   : > { %s964_s23 = sshll.u32 %s499_s19, 2  ;;  %541 = vst.msk [vmem:[#allocation3 + $0x8] sm:$0xff] %vm537_vm0, %v1201_v0  ;;  %s963_s27 = sshll.u32 %s1469_s11, 2  ;;  %991 = vmatpush.msra.mxu3 %v635_v8  ;;  %v633_v36 = vld [vmem:[%s1435_s5] sm:$0xff]  ;;  %v634_v43 = vld [vmem:[%s1435_s5 + $0x8] sm:$0xff] }
  0x2e   : > { %s504_s26 = scalar_lea.vmem %s1431_s1, %s964_s23  ;;  %542 = vst.msk [vmem:[#allocation4] sm:$0xff] %vm537_vm0, %v1201_v0  ;;  %s496_s20 = scalar_lea.vmem %s1430_s0, %s963_s27 }
  0x2f   : > { %543 = vst.msk [vmem:[#allocation4 + $0x8] sm:$0xff] %vm537_vm0, %v1201_v0  ;;  %v548_v1 = vld [vmem:[%s504_s26] sm:$0xf]  ;;  %698 = vmatpush.msrb.mxu3 %v635_v8  ;;  %s506_s18 = sadd.s32 %s1183_s12, %s965_s29 }
  0x30   : > { %v559_v3 = vsel %vm554_vm1, %v548_v1, 0  ;;  %v990_v5 = vld [vmem:[%s496_s20] sm:$0xff]  ;;  %p507_p2 = scmp.lt.s32.totalorder %s506_s18, 7 }
  0x31   : > { %568 = vmatpush.bf16.xpose.msra.mxu0 %v559_v3  ;;  %v546_v9 = vld [vmem:[#allocation2] sm:$0xff] }
  0x32   : > { %v547_v15 = vld [vmem:[#allocation2 + $0x8] sm:$0xff]  ;;  %s1471_s18 = smov (!%p507_p2, %s506_s18), 7 }
  0x33   : > { %979 = vmatmul.msk.bf16.vlgmr.msra.gmra.mxu1 %vm554_vm1, %v990_v5  ;;  %980 = vmatmul.msk.bf16.vlgmr.msra.gmra.mxu2 %vm554_vm1, %v990_v5  ;;  %v580_v10 = vld [vmem:[#allocation3] sm:$0xff]  ;;  %s1373_s22 = sshll.u32 %s1471_s18, 3 }
  0x34   : > { %v581_v16 = vld [vmem:[#allocation3 + $0x8] sm:$0xff]  ;;  %s529_s15 = scalar_lea.vmem %s1439_s9, %s1373_s22  ;;  %s511_s25 = scalar_lea.vmem %s1437_s7, %s1373_s22 }
  0x35   : > { %v604_v25 = vld [vmem:[#allocation4] sm:$0xff]  ;;  %s520_s28 = scalar_lea.vmem %s1438_s8, %s1373_s22 }
  0x36   : > { %v605_v28 = vld [vmem:[#allocation4 + $0x8] sm:$0xff] }
  0x38   : > { %978 = vmatmul.msk.bf16.vlgmr.msra.gmra.mxu0 %vm554_vm1, %v990_v5 }
  0x39   : > { %663 = vmatpush.msrb.mxu0 %v635_v8 }
  0xb0   : > { %v595_v12 = vpop.f32.mrf.mxu1 }
  0xb1   : > { %v600_v14 = vadd.f32 %v595_v12, %v580_v10 }
  0xb3   : > { %602 = vst.msk [vmem:[#allocation3] sm:$0xff] %vm537_vm0, %v600_v14 }
  0xb5   : > { %v570_v11 = vpop.f32.mrf.mxu0 }
  0xb6   : > { %v575_v13 = vadd.f32 %v570_v11, %v546_v9  ;;  %v619_v26 = vpop.f32.mrf.mxu2 }
  0xb7   : > { %v624_v27 = vadd.f32 %v619_v26, %v604_v25 }
  0xb8   : > { %578 = vst.msk [vmem:[#allocation2] sm:$0xff] %vm537_vm0, %v575_v13  ;;  %v597_v18 = vpop.f32.mrf.mxu1 }
  0xb9   : > { %v601_v20 = vadd.f32 %v597_v18, %v581_v16  ;;  %626 = vst.msk [vmem:[#allocation4] sm:$0xff] %vm537_vm0, %v624_v27 }
  0xba   : > { %v638_v23 = vld [vmem:[#allocation3] sm:$0xff] }
  0xbb   : > { %603 = vst.msk [vmem:[#allocation3 + $0x8] sm:$0xff] %vm537_vm0, %v601_v20  ;;  %v675_v50 = vmul.f32 %v638_v23, %v631_v35 }
  0xbd   : > { %v572_v17 = vpop.f32.mrf.mxu0 }
  0xbe   : > { %v576_v19 = vadd.f32 %v572_v17, %v547_v15  ;;  %v621_v29 = vpop.f32.mrf.mxu2 }
  0xbf   : > { %v636_v21 = vld [vmem:[#allocation2] sm:$0xff]  ;;  %v625_v31 = vadd.f32 %v621_v29, %v605_v28 }
  0xc0   : > { %579 = vst.msk [vmem:[#allocation2 + $0x8] sm:$0xff] %vm537_vm0, %v576_v19  ;;  %981 = vmatmul.msk.f32.vlgmr.msrb.gmra.mxu0 %vm537_vm0, %v636_v21  ;;  %v719_v30 = vld [vmem:[#allocation4] sm:$0xff]  ;;  %v640_v38 = vmul.f32 %v636_v21, %v631_v35 }
  0xc1   : > { %v721_v32 = vpack.c.bf16 %v719_v30, %v719_v30  ;;  %627 = vst.msk [vmem:[#allocation4 + $0x8] sm:$0xff] %vm537_vm0, %v625_v31 }
  0xc2   : > { %v639_v24 = vld [vmem:[#allocation3 + $0x8] sm:$0xff] }
  0xc3   : > { %723 = vst.msk [vmem:[%s529_s15] sm:$0xf] %vm712_vm2, %v721_v32  ;;  %v676_v55 = vmul.f32 %v639_v24, %v632_v42 }
  0xc7   : > { %v637_v22 = vld [vmem:[#allocation2 + $0x8] sm:$0xff] }
  0xc8   : > { %982 = vmatmul.msk.f32.vlgmr.msra.gmra.mxu3 %vm537_vm0, %v637_v22  ;;  %v720_v33 = vld [vmem:[#allocation4 + $0x8] sm:$0xff]  ;;  %v641_v45 = vmul.f32 %v637_v22, %v632_v42 }
  0xc9   : > { %v722_v34 = vpack.c.bf16 %v720_v33, %v720_v33 }
  0xcb   : > { %724 = vst.msk [vmem:[%s529_s15 + $0x4] sm:$0xf] %vm712_vm2, %v722_v34 }
  0xd0   : > { %983 = vmatmul.msk.f32.vlgmr.msrb.gmra.mxu3 %vm537_vm0, %v638_v23 }
  0xd8   : > { %984 = vmatmul.msk.f32.gmra.mxu3 %vm537_vm0, %v639_v24 }
 0x13d   : > { %v665_v37 = vpop.f32.mrf.mxu0 }
 0x13e   : > { %v671_v39 = vmul.f32 %v665_v37, %v633_v36 }
 0x140   : > { %v673_v40 = vadd.f32 %v671_v39, %v640_v38 }
 0x142   : > { %v710_v41 = vpack.c.bf16 %v673_v40, %v673_v40 }
 0x144   : > { %713 = vst.msk [vmem:[%s511_s25] sm:$0xf] %vm712_vm2, %v710_v41 }
 0x14b   : > { %v668_v44 = vpop.f32.mrf.mxu3 }
 0x14c   : > { %v672_v46 = vmul.f32 %v668_v44, %v634_v43 }
 0x14e   : > { %v674_v47 = vadd.f32 %v672_v46, %v641_v45 }
 0x150   : > { %v711_v48 = vpack.c.bf16 %v674_v47, %v674_v47 }
 0x152   : > { %714 = vst.msk [vmem:[%s511_s25 + $0x4] sm:$0xf] %vm712_vm2, %v711_v48 }
 0x153   : > { %v700_v49 = vpop.f32.mrf.mxu3 }
 0x154   : > { %v706_v51 = vmul.f32 %v700_v49, %v633_v36 }
 0x156   : > { %v708_v52 = vadd.f32 %v706_v51, %v675_v50 }
 0x158   : > { %v715_v53 = vpack.c.bf16 %v708_v52, %v708_v52 }
 0x15a   : > { %717 = vst.msk [vmem:[%s520_s28] sm:$0xf] %vm712_vm2, %v715_v53 }
 0x15b   : > { %v703_v54 = vpop.f32.mrf.mxu3 }
 0x15c   : > { %v707_v56 = vmul.f32 %v703_v54, %v634_v43 }
 0x15e   : > { %v709_v57 = vadd.f32 %v707_v56, %v676_v55 }
 0x160   : > { %v716_v58 = vpack.c.bf16 %v709_v57, %v709_v57 }
 0x162   : > { %718 = vst.msk [vmem:[%s520_s28 + $0x4] sm:$0xf] %vm712_vm2, %v716_v58 }
 0x163 PF: > { %s26_s16 = sadd.s32 1, %s1199_s16   ;;  %s1454_s29 = sld [smem:[#allocation11_spill]] }
 0x164   : > { %p23_p3 = scmp.ge.s32.totalorder %s26_s16, 10   ;;  %s1455_s11 = sld [smem:[#allocation16_spill]] }
 0x165   : > { %s1456_s12 = sld [smem:[#allocation12_spill]]  ;;  %s1460_s30 = smov %s1175_s10 }
 0x166   : > { %s1457_s13 = sld [smem:[#allocation13_spill]]  ;;  %25 = sbr.rel (!%p23_p3) target bundleno = 9 (0x9), region = 139 }
 0x167   : > { %s1458_s14 = sld [smem:[#allocation14_spill]] }
 0x168   : > { %s1459_s15 = sld [smem:[#allocation15_spill]] }
 0x169   : > { %s1461_s10 = smov %s1454_s29 }
 0x16b   :  { %796 = vsyncpa [#allocation6], 1 }
 0x16c   :  { %798 = vsyncpa [#allocation6 + $0x1], 1 }
 0x16d   :  { %799 = vsyncpa [#allocation8], 1 }
 0x16e   :  { %801 = vsyncpa [#allocation8 + $0x1], 1 }

</bundles_post_ra>
